<compile_context>
chip_gen: v7x
topology: tpu7x:2x2x1
jax: 0.10.0
libtpu: 0.0.40
codegen_flags: <defaults>
</compile_context>

<pallas_src>
import jax
import jax.numpy as jnp
from jax.experimental import pallas as pl
from jax.experimental.pallas import tpu as pltpu


def _make_deepsurv_kernel(n_layers, compute_dtype, cast_inputs):
    """Fused transposed-MLP kernel: features on sublanes, batch on lanes."""

    def kernel(*refs):
        xT_ref = refs[0]          # (n_in, TB) f32, batch on lanes
        o_ref = refs[-1]          # (1, TB)
        wb_refs = refs[1:-1]      # [w1T, b1, ..., w_{L-1}T, b_{L-1}, w_head, b_head]

        h = xT_ref[...]                                   # (n_in, TB)
        if cast_inputs:
            h = h.astype(compute_dtype)

        # Hidden layers: MXU matmul (lane-dense TB-wide output) + bias + ReLU.
        for li in range(n_layers - 1):
            wT = wb_refs[2 * li][...]                     # (d_out, d_in)
            b = wb_refs[2 * li + 1][...]                  # (d_out, 1) f32
            acc = jnp.dot(wT, h, preferred_element_type=jnp.float32)   # (d_out, TB)
            h = jnp.maximum(acc + b, 0.0)                 # bias+ReLU in f32 (v5e-safe)
            if cast_inputs:
                h = h.astype(compute_dtype)

        # Risk head (out_features == 1): VPU multiply + sublane reduce (XLU),
        # not an MXU matvec with one live output column.
        w_head = wb_refs[-2][...]                         # (d_last, 1) f32
        b_head = wb_refs[-1][...]                         # (1, 1) f32
        risk = jnp.sum(h.astype(jnp.float32) * w_head, axis=0, keepdims=True) + b_head
        o_ref[...] = risk.astype(o_ref.dtype)             # lane-dense (1, TB) store

    return kernel


def _pick_tile_cols(batch, n_in, hidden_sizes):
    """Batch-tile (lane) width: target ~4096, multiple of 128, VMEM-budgeted.

    Rough live bytes per batch column: double-buffered x tile (2*n_in rows) plus
    f32 activations (~2x the summed hidden widths, counting matmul result and
    post-ReLU copy).  Budget ~12 MiB of activations/tiles so that even on v7x
    (64 MiB physical / 32 MiB scoped) double buffering stays comfortable.
    """
    target = 4096
    act_rows = 2 * n_in + 2 * sum(hidden_sizes)
    budget = 12 * 1024 * 1024
    max_cols = max(128, budget // (4 * max(act_rows, 1)))
    tb = min(target, int(max_cols))
    tb = max(128, (tb // 128) * 128)
    batch_pad = ((batch + 127) // 128) * 128
    return min(tb, batch_pad)


def deepsurv_forward(x, params, tile_cols=None, matmul_dtype=jnp.float32):
    """DeepSurv forward.

    x: (B, n_in) f32.  params: [(w, b), ...] with w (d_in, d_out), b (1, d_out);
    the last layer must have d_out == 1.  Returns risk scores (B, 1) f32.
    matmul_dtype: set to jnp.bfloat16 on v6e/v7x for MXU throughput (accumulation
    stays f32; bias/ReLU/head stay f32).
    """
    B, n_in = x.shape
    n_layers = len(params)
    assert params[-1][0].shape[1] == 1, "last layer must have a single output unit"

    hidden_sizes = [w.shape[1] for w, _ in params[:-1]]
    cast_inputs = jnp.dtype(matmul_dtype) != jnp.dtype(jnp.float32)

    tb = tile_cols if tile_cols is not None else _pick_tile_cols(B, n_in, hidden_sizes)
    tb = max(128, (int(tb) // 128) * 128)
    B_pad = pl.cdiv(B, tb) * tb

    # One-time host-side layout plumbing: pad batch, go feature-major (lane-dense).
    x32 = x.astype(jnp.float32)
    if B_pad != B:
        x32 = jnp.pad(x32, ((0, B_pad - B), (0, 0)))
    xT = x32.T                                             # (n_in, B_pad)

    flat_wb = []
    in_specs = [pl.BlockSpec((n_in, tb), lambda i: (0, i))]
    for li, (w, b) in enumerate(params):
        if li < n_layers - 1:
            wk = w.T.astype(matmul_dtype)                  # (d_out, d_in), pre-transposed
            bk = b.reshape(-1, 1).astype(jnp.float32)      # (d_out, 1) column
        else:
            wk = w.astype(jnp.float32)                     # (d_last, 1) head column
            bk = b.reshape(1, 1).astype(jnp.float32)       # (1, 1)
        flat_wb.extend([wk, bk])
        # Weights/biases: full-array blocks, resident in VMEM across the grid.
        in_specs.append(pl.BlockSpec(wk.shape, lambda i: (0, 0)))
        in_specs.append(pl.BlockSpec(bk.shape, lambda i: (0, 0)))

    flops = sum(2 * B_pad * w.shape[0] * w.shape[1] for w, _ in params)
    bytes_accessed = 4 * B_pad * (n_in + 1) + sum(
        int(a.size) * a.dtype.itemsize for a in flat_wb)

    out = pl.pallas_call(
        _make_deepsurv_kernel(n_layers, matmul_dtype, cast_inputs),
        out_shape=jax.ShapeDtypeStruct((1, B_pad), jnp.float32),
        grid_spec=pltpu.PrefetchScalarGridSpec(
            num_scalar_prefetch=0,
            grid=(B_pad // tb,),
            in_specs=in_specs,
            out_specs=pl.BlockSpec((1, tb), lambda i: (0, i)),
        ),
        compiler_params=pltpu.CompilerParams(
            dimension_semantics=("parallel",),      # batch tiles are independent
            vmem_limit_bytes=32 * 1024 * 1024,      # raise v5e's 16 MiB default
        ),
        cost_estimate=pl.CostEstimate(
            flops=int(flops), transcendentals=0, bytes_accessed=int(bytes_accessed)),
    )(xT, *flat_wb)

    return out[0, :B].reshape(B, 1)


def init_deepsurv_params(key, n_in, hidden_layers_sizes=(64, 32)):
    """Match nn.Linear default init: W, b ~ U(-1/sqrt(fan_in), 1/sqrt(fan_in)).
    Weights are stored as (fan_in, fan_out) for x @ W (the wrapper transposes)."""
    sizes = [n_in] + list(hidden_layers_sizes) + [1]
    params = []
    for i in range(len(sizes) - 1):
        fan_in, fan_out = sizes[i], sizes[i + 1]
        key, kw, kb = jax.random.split(key, 3)
        bound = 1.0 / float(fan_in) ** 0.5
        w = jax.random.uniform(kw, (fan_in, fan_out), jnp.float32, -bound, bound)
        b = jax.random.uniform(kb, (1, fan_out), jnp.float32, -bound, bound)
        params.append((w, b))
    return params


def deepsurv_reference(x, params):
    """Plain-JAX reference of the same forward pass."""
    h = x
    for w, b in params[:-1]:
        h = jnp.maximum(h @ w + b, 0.0)
    w, b = params[-1]
    return h @ w + b


if __name__ == "__main__":
    key = jax.random.PRNGKey(0)
    k_x1, k_x2, k_p = jax.random.split(key, 3)

    n_in = 32
    hidden = (64, 32)
    params = init_deepsurv_params(k_p, n_in, hidden)

    # Small, clean case (single grid step, padded batch lanes sliced off).
    x_small = jax.random.normal(k_x1, (8, n_in), dtype=jnp.float32)
    risk_small = deepsurv_forward(x_small, params)
    jax.block_until_ready(risk_small)
    assert risk_small.shape == (8, 1)
    assert jnp.allclose(risk_small, deepsurv_reference(x_small, params),
                        atol=1e-5, rtol=1e-5)

    # Ragged multi-tile case: forced small tile so the grid has several
    # "parallel" batch steps and the padding path is exercised.
    x_ragged = jax.random.normal(k_x2, (300, n_in), dtype=jnp.float32)
    risk_ragged = deepsurv_forward(x_ragged, params, tile_cols=128)
    jax.block_until_ready(risk_ragged)
    assert risk_ragged.shape == (300, 1)
    assert jnp.allclose(risk_ragged, deepsurv_reference(x_ragged, params),
                        atol=1e-5, rtol=1e-5)

    # bf16 matmul operands (v6e/v7x throughput path); looser tolerance vs f32 ref.
    risk_bf16 = deepsurv_forward(x_ragged, params, matmul_dtype=jnp.bfloat16)
    jax.block_until_ready(risk_bf16)
    assert risk_bf16.shape == (300, 1)
    assert jnp.allclose(risk_bf16, deepsurv_reference(x_ragged, params),
                        atol=5e-2, rtol=5e-2)

    print("KERNEL_OK")
</pallas_src>

<mosaic_0001>
module attributes {stable_mosaic.version = 11 : i64} {
  func.func @kernel(%arg0: i32, %arg1: memref<32x128xf32, #tpu.memory_space<vmem>>, %arg2: memref<64x32xf32, #tpu.memory_space<vmem>>, %arg3: memref<64x1xf32, #tpu.memory_space<vmem>>, %arg4: memref<32x64xf32, #tpu.memory_space<vmem>>, %arg5: memref<32x1xf32, #tpu.memory_space<vmem>>, %arg6: memref<32x1xf32, #tpu.memory_space<vmem>>, %arg7: memref<1x1xf32, #tpu.memory_space<vmem>>, %arg8: memref<1x128xf32, #tpu.memory_space<vmem>>) attributes {dimension_semantics = [#tpu.dimension_semantics<parallel>], iteration_bounds = array<i64: 1>, scalar_prefetch = 0 : i64, scratch_operands = 0 : i64, tpu.core_type = #tpu.core_type<tc>, window_params = [{transform_indices = @transform_0, window_bounds = array<i64: 32, 128>}, {pipeline_mode = #tpu.pipeline_mode<synchronous>, transform_indices = @transform_1, window_bounds = array<i64: 64, 32>}, {pipeline_mode = #tpu.pipeline_mode<synchronous>, transform_indices = @transform_2, window_bounds = array<i64: 64, 1>}, {pipeline_mode = #tpu.pipeline_mode<synchronous>, transform_indices = @transform_3, window_bounds = array<i64: 32, 64>}, {pipeline_mode = #tpu.pipeline_mode<synchronous>, transform_indices = @transform_4, window_bounds = array<i64: 32, 1>}, {pipeline_mode = #tpu.pipeline_mode<synchronous>, transform_indices = @transform_5, window_bounds = array<i64: 32, 1>}, {pipeline_mode = #tpu.pipeline_mode<synchronous>, transform_indices = @transform_6, window_bounds = array<i64: 1, 1>}, {transform_indices = @transform_7, window_bounds = array<i64: 1, 128>}]} {
    %c0 = arith.constant 0 : index
    %c0_0 = arith.constant 0 : index
    %0 = vector.load %arg1[%c0, %c0_0] : memref<32x128xf32, #tpu.memory_space<vmem>>, vector<32x128xf32>
    %c0_1 = arith.constant 0 : index
    %c0_2 = arith.constant 0 : index
    %1 = vector.load %arg2[%c0_1, %c0_2] : memref<64x32xf32, #tpu.memory_space<vmem>>, vector<64x32xf32>
    %c0_3 = arith.constant 0 : index
    %c0_4 = arith.constant 0 : index
    %2 = vector.load %arg3[%c0_3, %c0_4] : memref<64x1xf32, #tpu.memory_space<vmem>>, vector<64x1xf32>
    %cst = arith.constant dense<0.000000e+00> : vector<64x128xf32>
    %3 = tpu.matmul %1, %0, %cst {dimension_numbers = #tpu.dot_dimension_numbers<[1], [0], [0], [1], [0, 0, 1, 1], [], []>} : vector<64x32xf32>, vector<32x128xf32>, vector<64x128xf32> -> vector<64x128xf32>
    %4 = vector.broadcast %2 : vector<64x1xf32> to vector<64x128xf32>
    %5 = arith.addf %3, %4 : vector<64x128xf32>
    %cst_5 = arith.constant 0.000000e+00 : f32
    %6 = vector.broadcast %cst_5 : f32 to vector<64x128xf32>
    %7 = arith.maximumf %5, %6 : vector<64x128xf32>
    %c0_6 = arith.constant 0 : index
    %c0_7 = arith.constant 0 : index
    %8 = vector.load %arg4[%c0_6, %c0_7] : memref<32x64xf32, #tpu.memory_space<vmem>>, vector<32x64xf32>
    %c0_8 = arith.constant 0 : index
    %c0_9 = arith.constant 0 : index
    %9 = vector.load %arg5[%c0_8, %c0_9] : memref<32x1xf32, #tpu.memory_space<vmem>>, vector<32x1xf32>
    %cst_10 = arith.constant dense<0.000000e+00> : vector<32x128xf32>
    %10 = tpu.matmul %8, %7, %cst_10 {dimension_numbers = #tpu.dot_dimension_numbers<[1], [0], [0], [1], [0, 0, 1, 1], [], []>} : vector<32x64xf32>, vector<64x128xf32>, vector<32x128xf32> -> vector<32x128xf32>
    %11 = vector.broadcast %9 : vector<32x1xf32> to vector<32x128xf32>
    %12 = arith.addf %10, %11 : vector<32x128xf32>
    %cst_11 = arith.constant 0.000000e+00 : f32
    %13 = vector.broadcast %cst_11 : f32 to vector<32x128xf32>
    %14 = arith.maximumf %12, %13 : vector<32x128xf32>
    %c0_12 = arith.constant 0 : index
    %c0_13 = arith.constant 0 : index
    %15 = vector.load %arg6[%c0_12, %c0_13] : memref<32x1xf32, #tpu.memory_space<vmem>>, vector<32x1xf32>
    %c0_14 = arith.constant 0 : index
    %c0_15 = arith.constant 0 : index
    %16 = vector.load %arg7[%c0_14, %c0_15] : memref<1x1xf32, #tpu.memory_space<vmem>>, vector<1x1xf32>
    %17 = vector.broadcast %15 : vector<32x1xf32> to vector<32x128xf32>
    %18 = arith.mulf %14, %17 : vector<32x128xf32>
    %cst_16 = arith.constant dense<0.000000e+00> : vector<128xf32>
    %19 = vector.multi_reduction <add>, %18, %cst_16 [0] : vector<32x128xf32> to vector<128xf32>
    %20 = vector.shape_cast %19 : vector<128xf32> to vector<1x128xf32>
    %21 = vector.broadcast %16 : vector<1x1xf32> to vector<1x128xf32>
    %22 = arith.addf %20, %21 : vector<1x128xf32>
    %c0_17 = arith.constant 0 : index
    %c0_18 = arith.constant 0 : index
    %23 = vector.load %arg8[%c0_17, %c0_18] : memref<1x128xf32, #tpu.memory_space<vmem>>, vector<1x128xf32>
    tpu.vector_store %arg8[%c0_17, %c0_18], %22 {strides = array<i32>} : memref<1x128xf32, #tpu.memory_space<vmem>>, vector<1x128xf32>,
    return
  }
  func.func @transform_0(%arg0: i32) -> (i32, i32) {
    %c0_i32 = arith.constant 0 : i32
    %c0_i32_0 = arith.constant 0 : i32
    return %c0_i32, %arg0 : i32, i32
  }
  func.func @transform_1(%arg0: i32) -> (i32, i32) {
    %c0_i32 = arith.constant 0 : i32
    %c0_i32_0 = arith.constant 0 : i32
    %c0_i32_1 = arith.constant 0 : i32
    return %c0_i32, %c0_i32_0 : i32, i32
  }
  func.func @transform_2(%arg0: i32) -> (i32, i32) {
    %c0_i32 = arith.constant 0 : i32
    %c0_i32_0 = arith.constant 0 : i32
    %c0_i32_1 = arith.constant 0 : i32
    return %c0_i32, %c0_i32_0 : i32, i32
  }
  func.func @transform_3(%arg0: i32) -> (i32, i32) {
    %c0_i32 = arith.constant 0 : i32
    %c0_i32_0 = arith.constant 0 : i32
    %c0_i32_1 = arith.constant 0 : i32
    return %c0_i32, %c0_i32_0 : i32, i32
  }
  func.func @transform_4(%arg0: i32) -> (i32, i32) {
    %c0_i32 = arith.constant 0 : i32
    %c0_i32_0 = arith.constant 0 : i32
    %c0_i32_1 = arith.constant 0 : i32
    return %c0_i32, %c0_i32_0 : i32, i32
  }
  func.func @transform_5(%arg0: i32) -> (i32, i32) {
    %c0_i32 = arith.constant 0 : i32
    %c0_i32_0 = arith.constant 0 : i32
    %c0_i32_1 = arith.constant 0 : i32
    return %c0_i32, %c0_i32_0 : i32, i32
  }
  func.func @transform_6(%arg0: i32) -> (i32, i32) {
    %c0_i32 = arith.constant 0 : i32
    %c0_i32_0 = arith.constant 0 : i32
    %c0_i32_1 = arith.constant 0 : i32
    return %c0_i32, %c0_i32_0 : i32, i32
  }
  func.func @transform_7(%arg0: i32) -> (i32, i32) {
    %c0_i32 = arith.constant 0 : i32
    %c0_i32_0 = arith.constant 0 : i32
    return %c0_i32, %arg0 : i32, i32
  }
}

</mosaic_0001>

<bundles_post_ra>
// kernel: tpu_custom_call.1
= control target key start
LH: loop header
LB: loop body
LE: loop exit
PB: predicated region body
PF: predicated region fallthrough
CT: control target
= control target key end

     0   :  { %s715_s0 = inlined_call_operand.vmem [shape: f32[32,128], index: 0, kind: input, shape index: {}]   ;;  %s716_s1 = inlined_call_operand.vmem [shape: f32[64,32], index: 1, kind: input, shape index: {}]   ;;  %s717_s2 = inlined_call_operand.vmem [shape: f32[64,1], index: 2, kind: input, shape index: {}]   ;;  %s718_s3 = inlined_call_operand.vmem [shape: f32[32,64], index: 3, kind: input, shape index: {}]   ;;  %s719_s4 = inlined_call_operand.vmem [shape: f32[32,1], index: 4, kind: input, shape index: {}]   ;;  %s720_s5 = inlined_call_operand.vmem [shape: f32[32,1], index: 5, kind: input, shape index: {}]   ;;  %s721_s6 = inlined_call_operand.<no memory space> [shape: f32[1,1], index: 6, kind: input, shape index: {}]   ;;  %s722_s7 = inlined_call_operand.hbm [shape: f32[1,128], index: 7, kind: output, shape index: {}]  }
   0x1   :  { %v12_v0 = vstv %s721_s6 }
   0x2   :  { %13 = vst [vmem:[#allocation2] sm:$0x1] %v12_v0 }
   0x3   :  { %v29_v1 = vld [vmem:[%s715_s0] sm:$0xff]  ;;  %v30_v2 = vld [vmem:[%s715_s0 + $0x8] sm:$0xff]  ;;  %v31_v3 = vld [vmem:[%s715_s0 + $0x10] sm:$0xff]  ;;  %vm89_vm0 = vcmask 261120   ;;  %v550_v7 = vmov 0  }
   0x4   :  { %v498_v4 = vpack.c.bf16 %v30_v2, %v29_v1  ;;  %v32_v5 = vld [vmem:[%s715_s0 + $0x18] sm:$0xff]  ;;  %v33_v6 = vld [vmem:[%s716_s1] sm:$0xff]  ;;  %524 = vset.pattern.permute.xlu0 %v550_v7  ;;  %525 = vset.pattern.permute.xlu1 %v550_v7  ;;  %v43_v10 = vld [vmem:[%s717_s2 + $0x10] sm:$0xff] }
   0x5   :  { %v502_v8 = vpack.c.bf16 %v32_v5, %v31_v3  ;;  %464 = vmatprep.mubr.msk.f32.mxu0 %vm89_vm0, %v33_v6  ;;  %v41_v9 = vld [vmem:[%s717_s2] sm:$0xff]  ;;  %v42_v11 = vld [vmem:[%s717_s2 + $0x8] sm:$0xff]  ;;  %61 = vperm.xlu1 %525, %v43_v10   ;;  %v44_v12 = vld [vmem:[%s717_s2 + $0x18] sm:$0xff] }
   0x6   :  { %499 = vmatprep.subr.bf16.mxu0 %v498_v4  ;;  %51 = vperm.xlu0 %524, %v41_v9   ;;  %v34_v13 = vld [vmem:[%s716_s1 + $0x8] sm:$0xff]  ;;  %v35_v14 = vld [vmem:[%s716_s1 + $0x10] sm:$0xff] }
   0x7   :  { %501 = vmatpush3.bf16.msra.mxu0 %v498_v4 }
   0x8   :  { %503 = vmatprep.subr.bf16.mxu0 %v502_v8 }
   0xa   :  { %56 = vperm.xlu0 %524, %v42_v11  }
   0xb   :  { %505 = vmatpush3.bf16.msra.mxu0 %v502_v8 }
   0xc   :  { %14 = vsyncpa [#allocation4], 0  ;;  %v45_v15 = vld [vmem:[%s717_s2 + $0x20] sm:$0xff]  ;;  %66 = vperm.xlu1 %525, %v44_v12   ;;  %v46_v16 = vld [vmem:[%s717_s2 + $0x28] sm:$0xff]  ;;  %vm255_vm1 = vcmask 523264  }
   0xd   :  { %v36_v17 = vld [vmem:[%s716_s1 + $0x18] sm:$0xff]  ;;  %v37_v18 = vld [vmem:[%s716_s1 + $0x20] sm:$0xff]  ;;  %v47_v19 = vld [vmem:[%s717_s2 + $0x30] sm:$0xff] }
   0xe   :  { %465 = vmatmul.mubr.msk.f32.vlgmr.msra.gmra.mrb[0].mxu0 %vm89_vm0, %v34_v13  ;;  %71 = vperm.xlu0 %524, %v45_v15   ;;  %v48_v20 = vld [vmem:[%s717_s2 + $0x38] sm:$0xff]  ;;  %v38_v21 = vld [vmem:[%s716_s1 + $0x28] sm:$0xff]  ;;  %v39_v22 = vld [vmem:[%s716_s1 + $0x30] sm:$0xff] }
   0xf   :  { %467 = vmatprep.mubr.msk.f32.mxu0 %vm89_vm0, %v35_v14  ;;  %v231_v23 = vld [vmem:[%s719_s4] sm:$0xff]  ;;  %v232_v24 = vld [vmem:[%s719_s4 + $0x8] sm:$0xff]  ;;  %v40_v25 = vld [vmem:[%s716_s1 + $0x38] sm:$0xff] }
  0x10   :  { %76 = vperm.xlu1 %525, %v46_v16   ;;  %v233_v26 = vld [vmem:[%s719_s4 + $0x10] sm:$0xff]  ;;  %v234_v27 = vld [vmem:[%s719_s4 + $0x18] sm:$0xff]  ;;  %v357_v28 = vld [vmem:[%s720_s5] sm:$0xff] }
  0x11   :  { %v358_v29 = vld [vmem:[%s720_s5 + $0x8] sm:$0xff]  ;;  %v359_v30 = vld [vmem:[%s720_s5 + $0x10] sm:$0xff]  ;;  %v360_v31 = vld [vmem:[%s720_s5 + $0x18] sm:$0xff] }
  0x12   :  { %468 = vmatmul.mubr.msk.f32.gmra.mrb[2].mxu0 %vm89_vm0, %v36_v17  ;;  %81 = vperm.xlu0 %524, %v47_v19   ;;  %v361_v32 = vld [vmem:[#allocation2] sm:$0x1]  ;;  %v228_v6 = vld [vmem:[%s718_s3 + $0x8] sm:$0xff]  ;;  %v229_v7 = vld [vmem:[%s718_s3 + $0x10] sm:$0xff] }
  0x13   :  { %470 = vmatprep.mubr.msk.f32.mxu0 %vm89_vm0, %v37_v18  ;;  %v227_v33 = vld [vmem:[%s718_s3] sm:$0xff]  ;;  %v230_v8 = vld [vmem:[%s718_s3 + $0x18] sm:$0xff]  ;;  %s551_s3 = smov [#allocation3]  }
  0x14   :  { %86 = vperm.xlu1 %525, %v48_v20   ;;  %492 = vmatprep.mubr.msk.f32.mxu1 %vm255_vm1, %v227_v33  ;;  %s412_s12 = sshll.u32 %s551_s3, 4  ;;  %s413_s12 = int_to_ptr.vmem [resolvable:$true] %s412_s12 }
  0x15   :  { %s526_s13 = scalar_lea.vmem %s413_s12, 16  ;;  %s530_s14 = scalar_lea.vmem %s413_s12, 32 }
  0x16   :  { %471 = vmatmul.mubr.msk.f32.gmra.mrb[4].mxu0 %vm89_vm0, %v38_v21  ;;  %237 = vperm.xlu0 %524, %v231_v23   ;;  %p527_p0 = scmp.ne.s32.totalorder %s413_s12, %s526_s13  ;;  %p531_p1 = scmp.lt.s32.totalorder %s413_s12, %s413_s12 }
  0x17   :  { %473 = vmatprep.mubr.msk.f32.mxu0 %vm89_vm0, %v39_v22  ;;  %p532_p2 = scmp.lt.s32.totalorder %s530_s14, %s526_s13 }
  0x18   :  { %242 = vperm.xlu1 %525, %v232_v24  }
  0x19   :  { %p533_p3 = por %p532_p2, %p531_p1 }
  0x1a   :  { %474 = vmatmul.mubr.msk.f32.gmra.mrb[6].mxu0 %vm89_vm0, %v40_v25  ;;  %247 = vperm.xlu0 %524, %v233_v26  }
  0x1b   :  { %p534_p4 = pnand %p533_p3, %p527_p0 }
  0x1c   :  { %252 = vperm.xlu1 %525, %v234_v27  }
  0x1e   :  { %364 = vperm.xlu0 %524, %v357_v28  }
  0x20   :  { %369 = vperm.xlu1 %525, %v358_v29  }
  0x22   :  { %374 = vperm.xlu0 %524, %v359_v30  }
  0x24   :  { %379 = vperm.xlu1 %525, %v360_v31  }
  0x26   :  { %397 = vperm.xlu0 %524, %v361_v32  }
  0x84   :  { %v62_v35 = vpop.permute.xlu1 %61 }
  0x85   :  { %v52_v34 = vpop.permute.xlu0 %51 }
  0x89   :  { %v57_v36 = vpop.permute.xlu0 %56 }
  0x8b   :  { %v67_v37 = vpop.permute.xlu1 %66 }
  0x8d   :  { %v72_v50 = vpop.permute.xlu0 %71 }
  0x8f   :  { %v77_v47 = vpop.permute.xlu1 %76 }
  0x91   :  { %v82_v62 = vpop.permute.xlu0 %81 }
  0x93   :  { %v87_v59 = vpop.permute.xlu1 %86 }
  0x95   :  { %v238_v9 = vpop.permute.xlu0 %237 }
  0x97   :  { %v243_v10 = vpop.permute.xlu1 %242 }
  0x99   :  { %v248_v11 = vpop.permute.xlu0 %247 }
  0x9b   :  { %v253_v12 = vpop.permute.xlu1 %252 }
  0x9d   :  { %v365_v17 = vpop.permute.xlu0 %364 }
  0x9f   :  { %v370_v19 = vpop.permute.xlu1 %369 }
  0xa1   :  { %v375_v30 = vpop.permute.xlu0 %374 }
  0xa3   :  { %v380_v32 = vpop.permute.xlu1 %379 }
  0xe1   :  { %v466_v38 = vpop.f32.mrb[0].mxu0 }
  0xe2   :  { %v186_v39 = vadd.f32 %v466_v38, %v57_v36  ;;  %v180_v40 = vpop.f32.mrb[1].mxu0 }
  0xe3   :  { %v181_v41 = vadd.f32 %v180_v40, %v52_v34 }
  0xe4   :  { %v220_v42 = vmax.f32 %v186_v39, 0.0 }
  0xe5   :  { %v219_v43 = vmax.f32 %v181_v41, 0.0  ;;  %v469_v44 = vpop.f32.mrb[2].mxu0 }
  0xe6   :  { %v196_v45 = vadd.f32 %v469_v44, %v67_v37  ;;  %v190_v46 = vpop.f32.mrb[3].mxu0 }
  0xe7   :  { %v191_v48 = vadd.f32 %v190_v46, %v62_v35  ;;  %v506_v49 = vpack.c.bf16 %v220_v42, %v219_v43  ;;  %v400_v35 = vlaneseq  ;;  %v398_v43 = vpop.permute.xlu0 %397 }
  0xe8   :  { %v222_v51 = vmax.f32 %v196_v45, 0.0 }
  0xe9   :  { %v221_v52 = vmax.f32 %v191_v48, 0.0  ;;  %v472_v53 = vpop.f32.mrb[4].mxu0  ;;  %507 = vmatprep.subr.bf16.mxu1 %v506_v49  ;;  %v401_v38 = vshrl.u32 %v400_v35, 7 }
  0xea   :  { %v206_v54 = vadd.f32 %v472_v53, %v77_v47  ;;  %v200_v55 = vpop.f32.mrb[5].mxu0  ;;  %509 = vmatpush3.bf16.msra.mxu1 %v506_v49 }
  0xeb   :  { %v510_v56 = vpack.c.bf16 %v222_v51, %v221_v52  ;;  %v201_v57 = vadd.f32 %v200_v55, %v72_v50  ;;  %v402_v41 = vsub.s32 0, %v401_v38 }
  0xec   :  { %v224_v58 = vmax.f32 %v206_v54, 0.0 }
  0xed   :  { %v223_v60 = vmax.f32 %v201_v57, 0.0  ;;  %v475_v61 = vpop.f32.mrb[6].mxu0  ;;  %511 = vmatprep.subr.bf16.mxu1 %v510_v56  ;;  %v403_v45 = vrot.slane %v398_v43, %v402_v41 }
  0xee   :  { %v216_v63 = vadd.f32 %v475_v61, %v87_v59  ;;  %v210_v0 = vpop.f32.mrb[7].mxu0  ;;  %513 = vmatpush3.bf16.msra.mxu1 %v510_v56 }
  0xef   :  { %v514_v1 = vpack.c.bf16 %v224_v58, %v223_v60  ;;  %v211_v2 = vadd.f32 %v210_v0, %v82_v62 }
  0xf0   :  { %v226_v3 = vmax.f32 %v216_v63, 0.0 }
  0xf1   :  { %v225_v4 = vmax.f32 %v211_v2, 0.0  ;;  %515 = vmatprep.subr.bf16.mxu1 %v514_v1 }
  0xf2   :  { %517 = vmatpush3.bf16.msra.mxu1 %v514_v1 }
  0xf3   :  { %v518_v5 = vpack.c.bf16 %v226_v3, %v225_v4 }
  0xf5   :  { %519 = vmatprep.subr.bf16.mxu1 %v518_v5 }
  0xf6   :  { %521 = vmatpush3.bf16.msra.mxu1 %v518_v5 }
  0xf9   :  { %493 = vmatmul.mubr.msk.f32.vlgmr.msra.gmra.mrb[0].mxu1 %vm255_vm1, %v228_v6 }
  0xfa   :  { %495 = vmatprep.mubr.msk.f32.mxu1 %vm255_vm1, %v229_v7 }
  0xfd   :  { %496 = vmatmul.mubr.msk.f32.gmra.mrb[2].mxu1 %vm255_vm1, %v230_v8 }
 0x1cc   :  { %v494_v13 = vpop.f32.mrb[0].mxu1 }
 0x1cd   :  { %v340_v14 = vadd.f32 %v494_v13, %v243_v10  ;;  %v334_v15 = vpop.f32.mrb[1].mxu1 }
 0x1ce   :  { %v335_v16 = vadd.f32 %v334_v15, %v238_v9 }
 0x1cf   :  { %v354_v18 = vmax.f32 %v340_v14, 0.0 }
 0x1d0   :  { %v353_v20 = vmax.f32 %v335_v16, 0.0  ;;  %v497_v21 = vpop.f32.mrb[2].mxu1 }
 0x1d1   :  { %v383_v22 = vmul.f32 %v370_v19, %v354_v18  ;;  %v350_v23 = vadd.f32 %v497_v21, %v253_v12  ;;  %v344_v24 = vpop.f32.mrb[3].mxu1 }
 0x1d2   :  { %v382_v25 = vmul.f32 %v365_v17, %v353_v20  ;;  %v345_v26 = vadd.f32 %v344_v24, %v248_v11 }
 0x1d3   :  { %v356_v28 = vmax.f32 %v350_v23, 0.0 }
 0x1d4   :  { %v386_v27 = vadd.f32 %v383_v22, %v382_v25  ;;  %v355_v29 = vmax.f32 %v345_v26, 0.0 }
 0x1d5   :  { %v385_v33 = vmul.f32 %v380_v32, %v356_v28 }
 0x1d6   :  { %v384_v31 = vmul.f32 %v375_v30, %v355_v29 }
 0x1d8   :  { %v387_v34 = vadd.f32 %v386_v27, %v384_v31 }
 0x1da   :  { %v388_v36 = vadd.f32 %v387_v34, %v385_v33 }
 0x1dc   :  { %v389_v37 = vrot.slane %v388_v36, 4 }
 0x1de   :  { %v390_v39 = vadd.f32 %v389_v37, %v388_v36 }
 0x1e0   :  { %v391_v40 = vrot.slane %v390_v39, 2 }
 0x1e2   :  { %v392_v42 = vadd.f32 %v391_v40, %v390_v39 }
 0x1e4   :  { %v393_v44 = vrot.slane %v392_v42, 1 }
 0x1e6   :  { %v394_v46 = vadd.f32 %v393_v44, %v392_v42 }
 0x1e8   :  { %v404_v47 = vadd.f32 %v403_v45, %v394_v46 }
 0x1ea   :  { %405 = vst [vmem:[#allocation3] sm:$0x1] %v404_v47 }
 0x1eb   :  { %537 = shalt.err (!%p534_p4)
}
 0x1ec   :  { %s538_s16 = scalar_lea.hbm %s722_s7, 16 }
 0x1ed   :  { %p539_p5 = scmp.ne.s32.totalorder %s722_s7, %s538_s16  ;;  %p542_p6 = scmp.lt.u32.totalorder %s538_s16, %s722_s7 }
 0x1ef   :  { %p544_p7 = pnand %p542_p6, %p539_p5 }
 0x1f1   :  { %547 = shalt.err (!%p544_p7)
}
 0x1f2   :  { %415 = dma.vmem_to_hbm [thread:$0]  %s413_s12, 16, %s722_s7, [#allocation4]  }
 0x1f3   :  { %548 = dma.done.wait [#allocation4], 16  }
 0x1f4   :  { %549 = vsyncadd [#allocation4], 4294967280 }
 0x1f5   :  { %419 = vsyncpa [#allocation4], 1 }

</bundles_post_ra>
